<compile_context>
chip_gen: v7x
topology: tpu7x:2x2x1
jax: 0.10.0
libtpu: 0.0.40
codegen_flags: <defaults>
</compile_context>

<pallas_src>
import jax
import jax.numpy as jnp
import numpy as np
from jax.experimental import pallas as pl
from jax.experimental.pallas import tpu as pltpu


# ---------------------------------------------------------------------------
# Pallas kernel
# ---------------------------------------------------------------------------
def _make_channel_attention_kernel(C, W, H):
    P = W * H
    CC = C * C
    HALO = H + 1                     # zero halo on each side of the flat image

    def kernel(x1_ref, x2_ref, w1_ref, b1_ref, w23_ref, b23_ref, out_ref):
        x1 = x1_ref[0]               # (C, P)  channels on sublanes, spatial on lanes
        x2 = x2_ref[0]

        # lane position -> column index h inside an image row (for border masks)
        h_idx = jax.lax.broadcasted_iota(jnp.int32, (1, P), 1) % H
        mask_l = h_idx >= 1          # tap reads h-1: invalid at h == 0
        mask_r = h_idx <= H - 2      # tap reads h+1: invalid at h == H-1

        def conv3x3_bn(inp, w_ref, b_ref, cin):
            # Zero-pad the flattened spatial axis by H+1 on each side: this
            # provides real zeros for the row (w) direction; the column (h)
            # direction borders are zeroed with the lane masks above.
            zpad = jnp.zeros((cin, HALO), jnp.float32)
            padded = jnp.concatenate([zpad, inp, zpad], axis=1)     # (cin, P+2H+2)
            taps = []
            for ky in range(3):
                for kx in range(3):
                    s = ky * H + kx
                    t = padded[:, s:s + P]                          # (cin, P)
                    if kx == 0:
                        t = jnp.where(mask_l, t, 0.0)
                    elif kx == 2:
                        t = jnp.where(mask_r, t, 0.0)
                    taps.append(t)
            col = jnp.concatenate(taps, axis=0)                     # (9*cin, P)
            # single MXU matmul; BN scale already folded into the weights
            acc = jnp.dot(w_ref[...], col,
                          preferred_element_type=jnp.float32)       # (cout, P)
            return acc + b_ref[...]                                 # bias (cout, 1)

        # per-pixel outer product: row i*C+j = x1[i] * x2[j]  -> (C*C, P)
        # (sublane broadcast of each x1 row against all of x2)
        c = jnp.concatenate([x1[i:i + 1, :] * x2 for i in range(C)], axis=0)

        c_ = conv3x3_bn(c, w1_ref, b1_ref, CC)                      # (C,  P)
        ab = conv3x3_bn(c_, w23_ref, b23_ref, C)                    # (2C, P) fused
        alpha = ab[:C, :]
        beta = ab[C:, :]

        out_ref[0] = alpha * x1 + beta + x2                         # (C, P)

    return kernel


# ---------------------------------------------------------------------------
# Host-side parameter packing (fold BN scale into weights, fuse conv2/conv3)
# ---------------------------------------------------------------------------
def _pack_conv_bn(w_oihw, scale, bias):
    O, I = w_oihw.shape[:2]
    # (O, I, 3, 3) -> (O, 3, 3, I) -> (O, 9*I); column index = (ky*3+kx)*I + cin
    w = jnp.transpose(w_oihw, (0, 2, 3, 1)).reshape(O, 9 * I)
    return w * scale[:, None], bias[:, None]


def pack_params(params):
    (w1, s1, b1), (w2, s2, b2), (w3, s3, b3) = params
    w1b, b1b = _pack_conv_bn(w1, s1, b1)
    w23 = jnp.concatenate([w2, w3], axis=0)        # fuse alpha/beta convs on Cout
    s23 = jnp.concatenate([s2, s3], axis=0)
    bi23 = jnp.concatenate([b2, b3], axis=0)
    w23b, b23b = _pack_conv_bn(w23, s23, bi23)
    return w1b, b1b, w23b, b23b


# ---------------------------------------------------------------------------
# Wrapper (pallas_call)
# ---------------------------------------------------------------------------
def channel_attention(x1, x2, packed):
    """x1, x2: (N, C, W, H) float32 (NCHW). packed: output of pack_params."""
    N, C, W, H = x1.shape
    P = W * H
    w1b, b1b, w23b, b23b = packed

    # NCHW already has spatial last -> only reshapes, no transposes.
    x1r = x1.reshape(N, C, P)
    x2r = x2.reshape(N, C, P)

    kernel = _make_channel_attention_kernel(C, W, H)

    def full_spec(a):
        nd = a.ndim
        return pl.BlockSpec(a.shape, lambda n, _nd=nd: (0,) * _nd)

    out = pl.pallas_call(
        kernel,
        out_shape=jax.ShapeDtypeStruct((N, C, P), jnp.float32),
        grid_spec=pltpu.PrefetchScalarGridSpec(
            num_scalar_prefetch=0,
            grid=(N,),
            in_specs=[
                pl.BlockSpec((1, C, P), lambda n: (n, 0, 0)),
                pl.BlockSpec((1, C, P), lambda n: (n, 0, 0)),
                full_spec(w1b), full_spec(b1b),
                full_spec(w23b), full_spec(b23b),
            ],
            out_specs=pl.BlockSpec((1, C, P), lambda n: (n, 0, 0)),
        ),
        compiler_params=pltpu.CompilerParams(
            dimension_semantics=("parallel",)),
    )(x1r, x2r, w1b, b1b, w23b, b23b)

    return out.reshape(N, C, W, H)


# ---------------------------------------------------------------------------
# Deterministic parameter init (conv weight OIHW + folded BN scale/bias)
# ---------------------------------------------------------------------------
def init_params(key, C):
    CC = C * C
    eps = 1e-5

    def conv_bn(key, cin, cout):
        k1, k2, k3, k4, k5 = jax.random.split(key, 5)
        w = 0.1 * jax.random.normal(k1, (cout, cin, 3, 3), jnp.float32)  # OIHW
        gamma = 1.0 + 0.1 * jax.random.normal(k2, (cout,), jnp.float32)
        beta = 0.1 * jax.random.normal(k3, (cout,), jnp.float32)
        mean = 0.1 * jax.random.normal(k4, (cout,), jnp.float32)
        var = 0.5 + jax.random.uniform(k5, (cout,), jnp.float32)
        scale = gamma / jnp.sqrt(var + eps)
        bias = beta - mean * scale
        return w, scale, bias

    ks = jax.random.split(key, 3)
    cins = [CC, C, C]
    return [conv_bn(ks[i], cins[i], C) for i in range(3)]


# ---------------------------------------------------------------------------
# Pure-JAX reference (mirrors the PyTorch forward, BN in eval mode)
# ---------------------------------------------------------------------------
def ref_forward(x1, x2, params):
    N, C, W, H = x1.shape
    x1_ = jnp.transpose(x1, (0, 2, 3, 1)).reshape(N * W * H, C)
    x2_ = jnp.transpose(x2, (0, 2, 3, 1)).reshape(N * W * H, C)
    c = (x1_[:, :, None] * x2_[:, None, :]).reshape(N, W, H, C * C)
    c = jnp.transpose(c, (0, 3, 1, 2))

    def conv_bn(x, w, scale, bias):
        y = jax.lax.conv_general_dilated(
            x, w, window_strides=(1, 1), padding=((1, 1), (1, 1)),
            dimension_numbers=("NCHW", "OIHW", "NCHW"))
        return y * scale[None, :, None, None] + bias[None, :, None, None]

    (w1, s1, b1), (w2, s2, b2), (w3, s3, b3) = params
    c_ = conv_bn(c, w1, s1, b1)
    alpha = conv_bn(c_, w2, s2, b2)
    beta = conv_bn(c_, w3, s3, b3)
    return alpha * x1 + beta + x2


# ---------------------------------------------------------------------------
if __name__ == "__main__":
    key = jax.random.PRNGKey(0)
    N, C, W, H = 2, 4, 16, 16

    k1, k2, k3 = jax.random.split(key, 3)
    x1 = jax.random.normal(k1, (N, C, W, H), jnp.float32)
    x2 = jax.random.normal(k2, (N, C, W, H), jnp.float32)

    params = init_params(k3, C)          # OIHW conv weights + folded BN
    packed = pack_params(params)         # im2col weights, BN scale folded in

    out = channel_attention(x1, x2, packed)
    out = jax.block_until_ready(out)

    ref = jax.block_until_ready(ref_forward(x1, x2, params))
    np.testing.assert_allclose(np.asarray(out), np.asarray(ref),
                               atol=1e-4, rtol=1e-4)
    print("KERNEL_OK")
</pallas_src>

<mosaic_0001>
module attributes {stable_mosaic.version = 11 : i64} {
  func.func @kernel(%arg0: i32, %arg1: memref<1x4x256xf32, #tpu.memory_space<vmem>>, %arg2: memref<1x4x256xf32, #tpu.memory_space<vmem>>, %arg3: memref<4x144xf32, #tpu.memory_space<vmem>>, %arg4: memref<4x1xf32, #tpu.memory_space<vmem>>, %arg5: memref<8x36xf32, #tpu.memory_space<vmem>>, %arg6: memref<8x1xf32, #tpu.memory_space<vmem>>, %arg7: memref<1x4x256xf32, #tpu.memory_space<vmem>>) attributes {dimension_semantics = [#tpu.dimension_semantics<parallel>], iteration_bounds = array<i64: 2>, scalar_prefetch = 0 : i64, scratch_operands = 0 : i64, tpu.core_type = #tpu.core_type<tc>, window_params = [{transform_indices = @transform_0, window_bounds = array<i64: 1, 4, 256>}, {transform_indices = @transform_1, window_bounds = array<i64: 1, 4, 256>}, {pipeline_mode = #tpu.pipeline_mode<synchronous>, transform_indices = @transform_2, window_bounds = array<i64: 4, 144>}, {pipeline_mode = #tpu.pipeline_mode<synchronous>, transform_indices = @transform_3, window_bounds = array<i64: 4, 1>}, {pipeline_mode = #tpu.pipeline_mode<synchronous>, transform_indices = @transform_4, window_bounds = array<i64: 8, 36>}, {pipeline_mode = #tpu.pipeline_mode<synchronous>, transform_indices = @transform_5, window_bounds = array<i64: 8, 1>}, {transform_indices = @transform_6, window_bounds = array<i64: 1, 4, 256>}]} {
    %c0 = arith.constant 0 : index
    %c0_0 = arith.constant 0 : index
    %c0_1 = arith.constant 0 : index
    %0 = vector.load %arg1[%c0, %c0_0, %c0_1] : memref<1x4x256xf32, #tpu.memory_space<vmem>>, vector<1x4x256xf32>
    %1 = vector.shape_cast %0 : vector<1x4x256xf32> to vector<4x256xf32>
    %c0_2 = arith.constant 0 : index
    %c0_3 = arith.constant 0 : index
    %c0_4 = arith.constant 0 : index
    %2 = vector.load %arg2[%c0_2, %c0_3, %c0_4] : memref<1x4x256xf32, #tpu.memory_space<vmem>>, vector<1x4x256xf32>
    %3 = vector.shape_cast %2 : vector<1x4x256xf32> to vector<4x256xf32>
    %4 = tpu.iota {dimensions = array<i32: 1>} : vector<1x256xi32>
    %c16_i32 = arith.constant 16 : i32
    %c0_i32 = arith.constant 0 : i32
    %5 = arith.cmpi eq, %c16_i32, %c0_i32 : i32
    %c1_i32 = arith.constant 1 : i32
    %6 = arith.select %5, %c1_i32, %c16_i32 : i32
    %7 = vector.broadcast %6 : i32 to vector<1x256xi32>
    %8 = arith.remsi %4, %7 : vector<1x256xi32>
    %c0_i32_5 = arith.constant 0 : i32
    %9 = vector.broadcast %c0_i32_5 : i32 to vector<1x256xi32>
    %10 = arith.cmpi ne, %8, %9 : vector<1x256xi32>
    %c0_i32_6 = arith.constant 0 : i32
    %11 = vector.broadcast %c0_i32_6 : i32 to vector<1x256xi32>
    %12 = arith.cmpi slt, %8, %11 : vector<1x256xi32>
    %c0_i32_7 = arith.constant 0 : i32
    %13 = arith.cmpi slt, %6, %c0_i32_7 : i32
    %14 = vector.broadcast %13 : i1 to vector<1x256xi1>
    %15 = vector.broadcast %14 : vector<1x256xi1> to vector<1x256xi1>
    %16 = arith.xori %12, %15 : vector<1x256xi1>
    %17 = arith.andi %16, %10 : vector<1x256xi1>
    %18 = vector.broadcast %6 : i32 to vector<1x256xi32>
    %19 = arith.addi %8, %18 : vector<1x256xi32>
    %20 = arith.select %17, %19, %8 : vector<1x256xi1>, vector<1x256xi32>
    %c1_i32_8 = arith.constant 1 : i32
    %21 = vector.broadcast %c1_i32_8 : i32 to vector<1x256xi32>
    %22 = arith.cmpi sge, %20, %21 : vector<1x256xi32>
    %c14_i32 = arith.constant 14 : i32
    %23 = vector.broadcast %c14_i32 : i32 to vector<1x256xi32>
    %24 = arith.cmpi sle, %20, %23 : vector<1x256xi32>
    %25 = vector.extract_strided_slice %1 {offsets = [0, 0], sizes = [1, 256], strides = [1, 1]} : vector<4x256xf32> to vector<1x256xf32>
    %26 = vector.broadcast %25 : vector<1x256xf32> to vector<4x256xf32>
    %27 = arith.mulf %26, %3 : vector<4x256xf32>
    %28 = vector.extract_strided_slice %1 {offsets = [1, 0], sizes = [1, 256], strides = [1, 1]} : vector<4x256xf32> to vector<1x256xf32>
    %29 = vector.broadcast %28 : vector<1x256xf32> to vector<4x256xf32>
    %30 = arith.mulf %29, %3 : vector<4x256xf32>
    %31 = vector.extract_strided_slice %1 {offsets = [2, 0], sizes = [1, 256], strides = [1, 1]} : vector<4x256xf32> to vector<1x256xf32>
    %32 = vector.broadcast %31 : vector<1x256xf32> to vector<4x256xf32>
    %33 = arith.mulf %32, %3 : vector<4x256xf32>
    %34 = vector.extract_strided_slice %1 {offsets = [3, 0], sizes = [1, 256], strides = [1, 1]} : vector<4x256xf32> to vector<1x256xf32>
    %35 = vector.broadcast %34 : vector<1x256xf32> to vector<4x256xf32>
    %36 = arith.mulf %35, %3 : vector<4x256xf32>
    %37 = tpu.concatenate %27, %30, %33, %36 in 0 : vector<4x256xf32>, vector<4x256xf32>, vector<4x256xf32>, vector<4x256xf32> -> vector<16x256xf32>
    %cst = arith.constant 0.000000e+00 : f32
    %38 = vector.broadcast %cst : f32 to vector<16x17xf32>
    %39 = tpu.concatenate %38, %37, %38 in 1 : vector<16x17xf32>, vector<16x256xf32>, vector<16x17xf32> -> vector<16x290xf32>
    %40 = vector.extract_strided_slice %39 {offsets = [0, 0], sizes = [16, 256], strides = [1, 1]} : vector<16x290xf32> to vector<16x256xf32>
    %cst_9 = arith.constant 0.000000e+00 : f32
    %41 = vector.shape_cast %22 : vector<1x256xi1> to vector<1x256xi1>
    %42 = vector.broadcast %41 : vector<1x256xi1> to vector<16x256xi1>
    %43 = vector.broadcast %cst_9 : f32 to vector<16x256xf32>
    %44 = arith.select %42, %40, %43 : vector<16x256xi1>, vector<16x256xf32>
    %45 = vector.extract_strided_slice %39 {offsets = [0, 1], sizes = [16, 256], strides = [1, 1]} : vector<16x290xf32> to vector<16x256xf32>
    %46 = vector.extract_strided_slice %39 {offsets = [0, 2], sizes = [16, 256], strides = [1, 1]} : vector<16x290xf32> to vector<16x256xf32>
    %cst_10 = arith.constant 0.000000e+00 : f32
    %47 = vector.shape_cast %24 : vector<1x256xi1> to vector<1x256xi1>
    %48 = vector.broadcast %47 : vector<1x256xi1> to vector<16x256xi1>
    %49 = vector.broadcast %cst_10 : f32 to vector<16x256xf32>
    %50 = arith.select %48, %46, %49 : vector<16x256xi1>, vector<16x256xf32>
    %51 = vector.extract_strided_slice %39 {offsets = [0, 16], sizes = [16, 256], strides = [1, 1]} : vector<16x290xf32> to vector<16x256xf32>
    %cst_11 = arith.constant 0.000000e+00 : f32
    %52 = vector.shape_cast %22 : vector<1x256xi1> to vector<1x256xi1>
    %53 = vector.broadcast %52 : vector<1x256xi1> to vector<16x256xi1>
    %54 = vector.broadcast %cst_11 : f32 to vector<16x256xf32>
    %55 = arith.select %53, %51, %54 : vector<16x256xi1>, vector<16x256xf32>
    %56 = vector.extract_strided_slice %39 {offsets = [0, 17], sizes = [16, 256], strides = [1, 1]} : vector<16x290xf32> to vector<16x256xf32>
    %57 = vector.extract_strided_slice %39 {offsets = [0, 18], sizes = [16, 256], strides = [1, 1]} : vector<16x290xf32> to vector<16x256xf32>
    %cst_12 = arith.constant 0.000000e+00 : f32
    %58 = vector.shape_cast %24 : vector<1x256xi1> to vector<1x256xi1>
    %59 = vector.broadcast %58 : vector<1x256xi1> to vector<16x256xi1>
    %60 = vector.broadcast %cst_12 : f32 to vector<16x256xf32>
    %61 = arith.select %59, %57, %60 : vector<16x256xi1>, vector<16x256xf32>
    %62 = vector.extract_strided_slice %39 {offsets = [0, 32], sizes = [16, 256], strides = [1, 1]} : vector<16x290xf32> to vector<16x256xf32>
    %cst_13 = arith.constant 0.000000e+00 : f32
    %63 = vector.shape_cast %22 : vector<1x256xi1> to vector<1x256xi1>
    %64 = vector.broadcast %63 : vector<1x256xi1> to vector<16x256xi1>
    %65 = vector.broadcast %cst_13 : f32 to vector<16x256xf32>
    %66 = arith.select %64, %62, %65 : vector<16x256xi1>, vector<16x256xf32>
    %67 = vector.extract_strided_slice %39 {offsets = [0, 33], sizes = [16, 256], strides = [1, 1]} : vector<16x290xf32> to vector<16x256xf32>
    %68 = vector.extract_strided_slice %39 {offsets = [0, 34], sizes = [16, 256], strides = [1, 1]} : vector<16x290xf32> to vector<16x256xf32>
    %cst_14 = arith.constant 0.000000e+00 : f32
    %69 = vector.shape_cast %24 : vector<1x256xi1> to vector<1x256xi1>
    %70 = vector.broadcast %69 : vector<1x256xi1> to vector<16x256xi1>
    %71 = vector.broadcast %cst_14 : f32 to vector<16x256xf32>
    %72 = arith.select %70, %68, %71 : vector<16x256xi1>, vector<16x256xf32>
    %73 = tpu.concatenate %44, %45, %50, %55, %56, %61, %66, %67, %72 in 0 : vector<16x256xf32>, vector<16x256xf32>, vector<16x256xf32>, vector<16x256xf32>, vector<16x256xf32>, vector<16x256xf32>, vector<16x256xf32>, vector<16x256xf32>, vector<16x256xf32> -> vector<144x256xf32>
    %c0_15 = arith.constant 0 : index
    %c0_16 = arith.constant 0 : index
    %74 = vector.load %arg3[%c0_15, %c0_16] : memref<4x144xf32, #tpu.memory_space<vmem>>, vector<4x144xf32>
    %cst_17 = arith.constant dense<0.000000e+00> : vector<4x256xf32>
    %75 = tpu.matmul %74, %73, %cst_17 {dimension_numbers = #tpu.dot_dimension_numbers<[1], [0], [0], [1], [0, 0, 1, 1], [], []>} : vector<4x144xf32>, vector<144x256xf32>, vector<4x256xf32> -> vector<4x256xf32>
    %c0_18 = arith.constant 0 : index
    %c0_19 = arith.constant 0 : index
    %76 = vector.load %arg4[%c0_18, %c0_19] : memref<4x1xf32, #tpu.memory_space<vmem>>, vector<4x1xf32>
    %77 = vector.broadcast %76 : vector<4x1xf32> to vector<4x256xf32>
    %78 = arith.addf %75, %77 : vector<4x256xf32>
    %cst_20 = arith.constant 0.000000e+00 : f32
    %79 = vector.broadcast %cst_20 : f32 to vector<4x17xf32>
    %80 = tpu.concatenate %79, %78, %79 in 1 : vector<4x17xf32>, vector<4x256xf32>, vector<4x17xf32> -> vector<4x290xf32>
    %81 = vector.extract_strided_slice %80 {offsets = [0, 0], sizes = [4, 256], strides = [1, 1]} : vector<4x290xf32> to vector<4x256xf32>
    %cst_21 = arith.constant 0.000000e+00 : f32
    %82 = vector.shape_cast %22 : vector<1x256xi1> to vector<1x256xi1>
    %83 = vector.broadcast %82 : vector<1x256xi1> to vector<4x256xi1>
    %84 = vector.broadcast %cst_21 : f32 to vector<4x256xf32>
    %85 = arith.select %83, %81, %84 : vector<4x256xi1>, vector<4x256xf32>
    %86 = vector.extract_strided_slice %80 {offsets = [0, 1], sizes = [4, 256], strides = [1, 1]} : vector<4x290xf32> to vector<4x256xf32>
    %87 = vector.extract_strided_slice %80 {offsets = [0, 2], sizes = [4, 256], strides = [1, 1]} : vector<4x290xf32> to vector<4x256xf32>
    %cst_22 = arith.constant 0.000000e+00 : f32
    %88 = vector.shape_cast %24 : vector<1x256xi1> to vector<1x256xi1>
    %89 = vector.broadcast %88 : vector<1x256xi1> to vector<4x256xi1>
    %90 = vector.broadcast %cst_22 : f32 to vector<4x256xf32>
    %91 = arith.select %89, %87, %90 : vector<4x256xi1>, vector<4x256xf32>
    %92 = vector.extract_strided_slice %80 {offsets = [0, 16], sizes = [4, 256], strides = [1, 1]} : vector<4x290xf32> to vector<4x256xf32>
    %cst_23 = arith.constant 0.000000e+00 : f32
    %93 = vector.shape_cast %22 : vector<1x256xi1> to vector<1x256xi1>
    %94 = vector.broadcast %93 : vector<1x256xi1> to vector<4x256xi1>
    %95 = vector.broadcast %cst_23 : f32 to vector<4x256xf32>
    %96 = arith.select %94, %92, %95 : vector<4x256xi1>, vector<4x256xf32>
    %97 = vector.extract_strided_slice %80 {offsets = [0, 17], sizes = [4, 256], strides = [1, 1]} : vector<4x290xf32> to vector<4x256xf32>
    %98 = vector.extract_strided_slice %80 {offsets = [0, 18], sizes = [4, 256], strides = [1, 1]} : vector<4x290xf32> to vector<4x256xf32>
    %cst_24 = arith.constant 0.000000e+00 : f32
    %99 = vector.shape_cast %24 : vector<1x256xi1> to vector<1x256xi1>
    %100 = vector.broadcast %99 : vector<1x256xi1> to vector<4x256xi1>
    %101 = vector.broadcast %cst_24 : f32 to vector<4x256xf32>
    %102 = arith.select %100, %98, %101 : vector<4x256xi1>, vector<4x256xf32>
    %103 = vector.extract_strided_slice %80 {offsets = [0, 32], sizes = [4, 256], strides = [1, 1]} : vector<4x290xf32> to vector<4x256xf32>
    %cst_25 = arith.constant 0.000000e+00 : f32
    %104 = vector.shape_cast %22 : vector<1x256xi1> to vector<1x256xi1>
    %105 = vector.broadcast %104 : vector<1x256xi1> to vector<4x256xi1>
    %106 = vector.broadcast %cst_25 : f32 to vector<4x256xf32>
    %107 = arith.select %105, %103, %106 : vector<4x256xi1>, vector<4x256xf32>
    %108 = vector.extract_strided_slice %80 {offsets = [0, 33], sizes = [4, 256], strides = [1, 1]} : vector<4x290xf32> to vector<4x256xf32>
    %109 = vector.extract_strided_slice %80 {offsets = [0, 34], sizes = [4, 256], strides = [1, 1]} : vector<4x290xf32> to vector<4x256xf32>
    %cst_26 = arith.constant 0.000000e+00 : f32
    %110 = vector.shape_cast %24 : vector<1x256xi1> to vector<1x256xi1>
    %111 = vector.broadcast %110 : vector<1x256xi1> to vector<4x256xi1>
    %112 = vector.broadcast %cst_26 : f32 to vector<4x256xf32>
    %113 = arith.select %111, %109, %112 : vector<4x256xi1>, vector<4x256xf32>
    %114 = tpu.concatenate %85, %86, %91, %96, %97, %102, %107, %108, %113 in 0 : vector<4x256xf32>, vector<4x256xf32>, vector<4x256xf32>, vector<4x256xf32>, vector<4x256xf32>, vector<4x256xf32>, vector<4x256xf32>, vector<4x256xf32>, vector<4x256xf32> -> vector<36x256xf32>
    %c0_27 = arith.constant 0 : index
    %c0_28 = arith.constant 0 : index
    %115 = vector.load %arg5[%c0_27, %c0_28] : memref<8x36xf32, #tpu.memory_space<vmem>>, vector<8x36xf32>
    %cst_29 = arith.constant dense<0.000000e+00> : vector<8x256xf32>
    %116 = tpu.matmul %115, %114, %cst_29 {dimension_numbers = #tpu.dot_dimension_numbers<[1], [0], [0], [1], [0, 0, 1, 1], [], []>} : vector<8x36xf32>, vector<36x256xf32>, vector<8x256xf32> -> vector<8x256xf32>
    %c0_30 = arith.constant 0 : index
    %c0_31 = arith.constant 0 : index
    %117 = vector.load %arg6[%c0_30, %c0_31] : memref<8x1xf32, #tpu.memory_space<vmem>>, vector<8x1xf32>
    %118 = vector.broadcast %117 : vector<8x1xf32> to vector<8x256xf32>
    %119 = arith.addf %116, %118 : vector<8x256xf32>
    %120 = vector.extract_strided_slice %119 {offsets = [0, 0], sizes = [4, 256], strides = [1, 1]} : vector<8x256xf32> to vector<4x256xf32>
    %121 = vector.extract_strided_slice %119 {offsets = [4, 0], sizes = [4, 256], strides = [1, 1]} : vector<8x256xf32> to vector<4x256xf32>
    %122 = arith.mulf %120, %1 : vector<4x256xf32>
    %123 = arith.addf %122, %121 : vector<4x256xf32>
    %124 = arith.addf %123, %3 : vector<4x256xf32>
    %c0_32 = arith.constant 0 : index
    %c0_33 = arith.constant 0 : index
    %c0_34 = arith.constant 0 : index
    %125 = vector.load %arg7[%c0_32, %c0_33, %c0_34] : memref<1x4x256xf32, #tpu.memory_space<vmem>>, vector<1x4x256xf32>
    %126 = vector.shape_cast %125 : vector<1x4x256xf32> to vector<4x256xf32>
    %127 = vector.shape_cast %124 : vector<4x256xf32> to vector<1x4x256xf32>
    tpu.vector_store %arg7[%c0_32, %c0_33, %c0_34], %127 {strides = array<i32>} : memref<1x4x256xf32, #tpu.memory_space<vmem>>, vector<1x4x256xf32>,
    return
  }
  func.func @transform_0(%arg0: i32) -> (i32, i32, i32) {
    %c0_i32 = arith.constant 0 : i32
    %c0_i32_0 = arith.constant 0 : i32
    %c0_i32_1 = arith.constant 0 : i32
    return %arg0, %c0_i32, %c0_i32_0 : i32, i32, i32
  }
  func.func @transform_1(%arg0: i32) -> (i32, i32, i32) {
    %c0_i32 = arith.constant 0 : i32
    %c0_i32_0 = arith.constant 0 : i32
    %c0_i32_1 = arith.constant 0 : i32
    return %arg0, %c0_i32, %c0_i32_0 : i32, i32, i32
  }
  func.func @transform_2(%arg0: i32) -> (i32, i32) {
    %c0_i32 = arith.constant 0 : i32
    %c0_i32_0 = arith.constant 0 : i32
    %c0_i32_1 = arith.constant 0 : i32
    return %c0_i32, %c0_i32_0 : i32, i32
  }
  func.func @transform_3(%arg0: i32) -> (i32, i32) {
    %c0_i32 = arith.constant 0 : i32
    %c0_i32_0 = arith.constant 0 : i32
    %c0_i32_1 = arith.constant 0 : i32
    return %c0_i32, %c0_i32_0 : i32, i32
  }
  func.func @transform_4(%arg0: i32) -> (i32, i32) {
    %c0_i32 = arith.constant 0 : i32
    %c0_i32_0 = arith.constant 0 : i32
    %c0_i32_1 = arith.constant 0 : i32
    return %c0_i32, %c0_i32_0 : i32, i32
  }
  func.func @transform_5(%arg0: i32) -> (i32, i32) {
    %c0_i32 = arith.constant 0 : i32
    %c0_i32_0 = arith.constant 0 : i32
    %c0_i32_1 = arith.constant 0 : i32
    return %c0_i32, %c0_i32_0 : i32, i32
  }
  func.func @transform_6(%arg0: i32) -> (i32, i32, i32) {
    %c0_i32 = arith.constant 0 : i32
    %c0_i32_0 = arith.constant 0 : i32
    %c0_i32_1 = arith.constant 0 : i32
    return %arg0, %c0_i32, %c0_i32_0 : i32, i32, i32
  }
}

</mosaic_0001>

<bundles_post_ra>
// kernel: tpu_custom_call.1
= control target key start
LH: loop header
LB: loop body
LE: loop exit
PB: predicated region body
PF: predicated region fallthrough
CT: control target
= control target key end

     0   :  { %11 = vsyncpa [#allocation3], 0  ;;  %s2104_s0 = inlined_call_operand.hbm [shape: f32[2,4,256], index: 0, kind: input, shape index: {}]   ;;  %s2105_s1 = inlined_call_operand.vmem [shape: f32[2,4,256], index: 1, kind: input, shape index: {}]   ;;  %s2106_s2 = inlined_call_operand.hbm [shape: f32[4,144], index: 2, kind: input, shape index: {}]   ;;  %s2107_s3 = inlined_call_operand.vmem [shape: f32[4,1], index: 3, kind: input, shape index: {}]   ;;  %s2108_s4 = inlined_call_operand.vmem [shape: f32[8,36], index: 4, kind: input, shape index: {}]   ;;  %s2109_s5 = inlined_call_operand.vmem [shape: f32[8,1], index: 5, kind: input, shape index: {}]   ;;  %s2110_s6 = inlined_call_operand.hbm [shape: f32[2,4,256], index: 6, kind: output, shape index: {}]  }
   0x1   :  { %13 = vsyncpa [#allocation3 + $0x1], 0 }
   0x2   :  { %14 = vsyncpa [#allocation6], 0 }
   0x3   :  { %15 = vsyncpa [#allocation4], 0 }
   0x4   :  { %17 = vsyncpa [#allocation4 + $0x1], 0  ;;  %s1612_s21 = smov 0   ;;  %s1614_s22 = smov 0  }
   0x5   :  { %s1616_s23 = smov 0   ;;  %s1618_s24 = smov 0  }
   0x6 LB: > { %s1633_s25 = sadd.s32 4294967295, %s1561_s24   ;;  %s1090_s26 = sadd.s32 4294967294, %s1561_s24   ;;  %s1561_s24 = sphi %s1618_s24, %s2153_s24   ;;  %s1557_s23 = sphi %s1616_s23, %s2152_s23   ;;  %s1553_s22 = sphi %s1614_s22, %s2151_s22   ;;  %s1549_s21 = sphi %s1612_s21, %s2150_s21  }
   0x7   : > { %p43_p0 = scmp.ne.s32.totalorder %s1553_s22, %s1549_s21  ;;  %p2111_p1 = scmp.eq.s32.totalorder %s1633_s25, 0 }
   0x8   : > { %p183_p3 = scmp.eq.s32.totalorder %s1090_s26, 1  ;;  %p1091_p5 = scmp.ge.s32.totalorder %s1561_s24, 1 }
   0x9   : > { %p1642_p4 = por %p2111_p1, %p43_p0  ;;  %p190_p7 = scmp.lt.s32.totalorder %s1561_s24, 3 }
   0xa   : > { %p1647_p6 = por %p183_p3, %p43_p0  ;;  %s1563_s30 = smov [#allocation5]  }
   0xb   : > { %s2115_s27 = scalar_select %p1642_p4, 1, 0 }
   0xc   : > { %s2116_s28 = scalar_select %p1647_p6, 1, 0 }
   0xd   : > { %p1652_p8 = pnand %p1091_p5, %p190_p7  ;;  %s203_s7 = sshll.u32 %s1563_s30, 4  ;;  %s204_s7 = int_to_ptr.vmem [resolvable:$true] %s203_s7 }
   0xe   : > { %s1660_s8 = sadd.s32 1, %s1561_s24   ;;  %s30_s12 = sadd.s32 1, %s1557_s23 }
   0xf   : > { %s2117_s29 = scalar_select %p1652_p8, 1, 0 }
  0x10   : > { %p1203_p10 = pneg %p1652_p8  ;;  %s27_s10 = ssub.s32 %s1561_s24, %s1660_s8 }
  0x11   : > { %p1670_p12 = scmp.eq.s32.totalorder %s27_s10, 0  ;;  %s1433_s15 = scalar_lea.hbm %s2106_s2, 128 }
  0x12   : > { %p1664_p11 = pnand %p1203_p10, %p2111_p1  ;;  %p1434_p0 = scmp.ne.s32.totalorder %s2106_s2, %s1433_s15 }
  0x13   : > { %s2119_s11 = scalar_select %p1670_p12, 1, 0 }
  0x14   : > { %p1435_p3 = pneg %p1664_p11  ;;  %p1440_p10 = scmp.lt.u32.totalorder %s1433_s15, %s2106_s2 }
  0x16   : > { %p1436_p5 = pnand %p1435_p3, %p1434_p0 }
  0x18   : > { %p1437_p7 = pneg %p1436_p5 }
  0x1a   : > { %p1442_p9 = pnand %p1440_p10, %p1437_p7 }
  0x1c   : > { %1445 = shalt.err (!%p1442_p9)
}
  0x1d   : > { %s1446_s20 = scalar_lea.vmem %s204_s7, 128  ;;  %p1454_p6 = scmp.lt.s32.totalorder %s204_s7, %s204_s7 }
  0x1e   : > { %p1447_p1 = scmp.ne.s32.totalorder %s204_s7, %s1446_s20  ;;  %p1455_p4 = scmp.lt.s32.totalorder %s1446_s20, %s1446_s20 }
  0x20   : > { %p1449_p2 = pnand %p1447_p1, %p1435_p3  ;;  %p1456_p8 = por %p1455_p4, %p1454_p6 }
  0x22   : > { %p1450_p13 = pneg %p1449_p2 }
  0x24   : > { %p1457_p12 = pnand %p1456_p8, %p1450_p13 }
  0x26   : > { %1460 = shalt.err (!%p1457_p12)
}
  0x27   : > { %1206 = dma.hbm_to_vmem [thread:$0]  (!%p1664_p11), %s2106_s2, 128, %s204_s7, [#allocation6]  }
  0x28   : > { %p2120_p1 = scmp.ne.s32.totalorder %s2119_s11, 0  ;;  %p38_p2 = scmp.eq.s32.totalorder %s1561_s24, 0 }
  0x29   : > { %p2121_p4 = scmp.ne.s32.totalorder %s1557_s23, %s1553_s22  ;;  %p2122_p6 = scmp.eq.s32.totalorder %s1633_s25, 1 }
  0x2a   : > { %s1696_s10 = scalar_select %p2120_p1, %s1557_s23, %s30_s12  }
  0x2b   : > { %p1704_p8 = por %p2122_p6, %p2121_p4  ;;  %p1216_p9 = scmp.lt.s32.totalorder %s1561_s24, 2 }
  0x2c   : > { %s223_s13 = sand.u32 1, %s1557_s23   ;;  %p2124_p12 = pmov %p2121_p4 }
  0x2d   : > { %s1094_s14 = sshll.u32 %s223_s13, 3  ;;  %s1136_s15 = sshll.u32 %s1561_s24, 7 }
  0x2e   : > { %p39_p13 = por %p38_p2, %p2124_p12  ;;  %s1717_s7 = scalar_lea.hbm %s2104_s0, %s1136_s15 }
  0x2f   : > { %s227_s11 = scalar_lea.vmem [#allocation2], %s1094_s14  ;;  %s224_s19 = scalar_lea.sflag [#allocation3], %s223_s13 }
  0x30   : > { %s235_s12 = sshll.u32 %s227_s11, 4  ;;  %p1719_p11 = pnand %p1216_p9, %p39_p13  ;;  %s1723_s12 = int_to_ptr.vmem [resolvable:$true] %s235_s12 }
  0x31   : > { %s1461_s20 = scalar_lea.hbm %s1717_s7, 128  ;;  %s1466_s14 = scalar_lea.hbm %s2104_s0, 256 }
  0x32   : > { %p1462_p0 = scmp.ne.s32.totalorder %s1717_s7, %s1461_s20  ;;  %p1463_p3 = pneg %p1719_p11 }
  0x33   : > { %p1467_p10 = scmp.lt.u32.totalorder %s1717_s7, %s2104_s0  ;;  %p1468_p1 = scmp.lt.u32.totalorder %s1466_s14, %s1461_s20 }
  0x34   : > { %p1464_p5 = pnand %p1463_p3, %p1462_p0  ;;  %p1470_p4 = scmp.lt.u32.totalorder %s1461_s20, %s1717_s7 }
  0x35   : > { %p1469_p2 = por %p1468_p1, %p1467_p10 }
  0x36   : > { %p1465_p7 = pneg %p1464_p5 }
  0x37   : > { %p1471_p6 = por %p1470_p4, %p1469_p2 }
  0x39   : > { %p1472_p9 = pnand %p1471_p6, %p1465_p7 }
  0x3b   : > { %1475 = shalt.err (!%p1472_p9)
}
  0x3c   : > { %s1476_s13 = scalar_lea.vmem %s1723_s12, 128  ;;  %s1564_s17 = smov [#allocation2]  }
  0x3d   : > { %p1477_p12 = scmp.ne.s32.totalorder %s1723_s12, %s1476_s13  ;;  %s1481_s11 = sshll.u32 %s1564_s17, 4  ;;  %s1482_s11 = int_to_ptr.vmem [resolvable:$false] %s1481_s11 }
  0x3e   : > { %s1483_s26 = scalar_lea.vmem %s1482_s11, 256  ;;  %p1484_p5 = scmp.lt.s32.totalorder %s1723_s12, %s1482_s11 }
  0x3f   : > { %p1479_p13 = pnand %p1477_p12, %p1463_p3  ;;  %p1485_p10 = scmp.lt.s32.totalorder %s1483_s26, %s1476_s13 }
  0x41   : > { %p1480_p0 = pneg %p1479_p13  ;;  %p1486_p1 = por %p1485_p10, %p1484_p5 }
  0x43   : > { %p1487_p2 = pnand %p1486_p1, %p1480_p0 }
  0x45   : > { %1490 = shalt.err (!%p1487_p2)
}
  0x46   : > { %1210 = dma.hbm_to_vmem [thread:$0]  (!%p1719_p11), %s1717_s7, 128, %s1723_s12, %s224_s19  }
  0x47   : > { %p2126_p7 = scmp.ne.s32.totalorder %s2117_s29, 0 }
  0x48   : > { %s1753_s20 = sand.u32 (!%p2126_p7), 1, %s1553_s22   ;;  %p2127_p3 = scmp.ne.s32.totalorder (!%p2126_p7), %s2115_s27, 0 }
  0x49   : > { %252 = sbr.rel (%p2126_p7) target bundleno = 1117 (0x45d), region = 44  ;;  %s1098_s30 = sshll.u32 (!%p2126_p7), %s1753_s20, 3 }
  0x4a   : > { %s255_s14 = scalar_lea.sflag (!%p2126_p7), [#allocation3], %s1753_s20  ;;  %s258_s15 = scalar_lea.vmem (!%p2126_p7), [#allocation2], %s1098_s30 }
  0x50   : > { %1536 = dma.done.wait (%p2127_p3), %s255_s14, 128  }
  0x51   : > { %1538 = vsyncadd (%p2127_p3), %s255_s14, 4294967168  ;;  %p2128_p11 = scmp.eq.s32.totalorder %s1633_s25, 0 }
  0x53   : > { %1540 = dma.done.wait (%p2128_p11), [#allocation6], 128   ;;  %p2129_p4 = pmov %p2128_p11 }
  0x54   : > { %p296_p6 = scmp.lt.s32.totalorder %s1633_s25, 1  ;;  %v303_v0 = vlaneseq  ;;  %v1772_v10 = vld [vmem:[%s258_s15] sm:$0xff]  ;;  %vm430_vm0 = vcmask 1043456   ;;  %s1565_s19 = smov 17   ;;  %vm447_vm1 = vcmask 138240   ;;  %vm673_vm6 = vcmask 130048  }
  0x55   : > { %1542 = vsyncadd (%p2129_p4), [#allocation6], 4294967168  ;;  %s1566_s16 = smov 127   ;;  %s1567_s13 = smov 126   ;;  %vm2114_vm7 = vcmask 1039360   ;;  %vm488_vm8 = vcmask 1031168  }
  0x56   : > { %s297_s29 = scalar_select %p296_p6, %s1633_s25, 1  ;;  %v336_v1 = vshrl.u32 %v303_v0, 7  ;;  %v1802_v47 = vand.u32 127, %v303_v0  ;;  %vm513_vm13 = vcmask 916480   ;;  %vm634_vm14 = vcmask 908288  }
  0x57   : > { %s1568_s17 = smov 112   ;;  %s1569_s11 = smov 111   ;;  %vm538_vm15 = vcmask 900096  }
  0x58   : > { %s1137_s7 = sshll.u32 %s297_s29, 3  ;;  %v337_v2 = vsub.s32 0, %v336_v1  ;;  %v341_v3 = vsub.s32 4, %v336_v1  ;;  %v360_v4 = vsub.s32 1, %v336_v1  ;;  %v364_v5 = vsub.s32 5, %v336_v1  ;;  %s1570_s26 = smov 110  }
  0x59   : > { %s300_s27 = scalar_lea.vmem %s2105_s1, %s1137_s7  ;;  %v380_v6 = vsub.s32 2, %v336_v1  ;;  %v384_v7 = vsub.s32 6, %v336_v1  ;;  %v400_v8 = vsub.s32 3, %v336_v1  ;;  %v404_v9 = vsub.s32 7, %v336_v1  ;;  %s1571_s14 = smov 96  }
  0x5a   : > { %v1774_v11 = vld [vmem:[%s300_s27] sm:$0xff]  ;;  %v338_v12 = vrot.slane %v1772_v10, %v337_v2  ;;  %v342_v13 = vrot.slane %v1772_v10, %v341_v3  ;;  %v361_v15 = vrot.slane %v1772_v10, %v360_v4  ;;  %v365_v16 = vrot.slane %v1772_v10, %v364_v5  ;;  %s1572_s15 = smov 95   ;;  %s1573_s29 = smov 94  }
  0x5b   : > { %v1780_v14 = vcombine.high %v1774_v11, %v1774_v11  ;;  %v381_v17 = vrot.slane %v1772_v10, %v380_v6  ;;  %v385_v18 = vrot.slane %v1772_v10, %v384_v7  ;;  %v401_v19 = vrot.slane %v1772_v10, %v400_v8 }
  0x5c   : > { %v348_v20 = vrot.slane %v338_v12, %v337_v2  ;;  %v352_v21 = vrot.slane %v342_v13, %v337_v2  ;;  %v371_v22 = vrot.slane %v361_v15, %v360_v4  ;;  %v405_v23 = vrot.slane %v1772_v10, %v404_v9  ;;  %v665_v13 = vld [vmem:[%s2107_s3] sm:$0xf] }
  0x5d   : > { %v375_v24 = vrot.slane %v365_v16, %v360_v4  ;;  %v391_v25 = vrot.slane %v381_v17, %v380_v6  ;;  %v395_v26 = vrot.slane %v385_v18, %v380_v6  ;;  %v411_v27 = vrot.slane %v401_v19, %v400_v8 }
  0x5e   : > { %v356_v28 = vmul.f32 %v348_v20, %v1774_v11  ;;  %v376_v29 = vmul.f32 %v371_v22, %v1774_v11  ;;  %v415_v30 = vrot.slane %v405_v23, %v400_v8  ;;  %v357_v31 = vmul.f32 %v1780_v14, %v352_v21  ;;  %v1866_v8 = vld [vmem:[#allocation5] sm:$0xff] }
  0x5f   : > { %v377_v32 = vmul.f32 %v375_v24, %v1780_v14  ;;  %v396_v33 = vmul.f32 %v391_v25, %v1774_v11  ;;  %v416_v34 = vmul.f32 %v411_v27, %v1774_v11  ;;  %v397_v36 = vmul.f32 %v395_v26, %v1780_v14 }
  0x60   : > { %v420_v35 = vrot.slane %v376_v29, 4  ;;  %v417_v37 = vmul.f32 %v415_v30, %v1780_v14  ;;  %v1805_v48 = vadd.s32 128, %v1802_v47  ;;  %v310_v53 = vand.u32 15, %v1802_v47 }
  0x61   : > { %v421_v38 = vrot.slane %v377_v32, 4  ;;  %v426_v39 = vrot.slane %v416_v34, 4  ;;  %v672_v9 = vcombine.high %v1866_v8, %v1866_v8  ;;  %v1574_v12 = vmov 0  }
  0x62   : > { %v431_v40 = vsel %vm430_vm0, %v356_v28, %v420_v35  ;;  %v427_v41 = vrot.slane %v417_v37, 4  ;;  %v317_v52 = vand.u32 15, %v1805_v48  ;;  %vm1820_vm3 = vcmp.ge.s32.totalorder %v310_v53, 1  ;;  %1393 = vset.pattern.permute.xlu0 %v1574_v12  ;;  %1429 = vset.pattern.permute.xlu1 %v1574_v12 }
  0x63   : > { %v432_v42 = vsel %vm430_vm0, %v357_v31, %v421_v38  ;;  %v433_v43 = vsel %vm430_vm0, %v396_v33, %v426_v39  ;;  %vm1838_vm5 = vmpackc.low %vm1820_vm3, %vm1820_vm3  ;;  %1127 = vmatprep.mubr.msk.f32.mxu0 %vm673_vm6, %v672_v9  ;;  %vm1897_vm11 = vcmp.le.s32.totalorder %v310_v53, 14  ;;  %vm563_vm6 = vcmask 785408  }
  0x64   : > { %v1263_v44 = vpack.i.bf16 %v432_v42, %v431_v40  ;;  %v434_v45 = vsel %vm430_vm0, %v397_v36, %v427_v41  ;;  %vm1813_vm2 = vcmp.ge.s32.totalorder %v317_v52, 1  ;;  %vm1882_vm9 = vcmp.le.s32.totalorder %v317_v52, 14  ;;  %vm1908_vm12 = vmpackc.low %vm1897_vm11, %vm1897_vm11 }
  0x65   : > { %v1268_v46 = vpack.i.bf16 %v434_v45, %v433_v43  ;;  %vm1831_vm4 = vmpackc.low %vm1813_vm2, %vm1813_vm2 }
  0x66   : > { %1264 = vrot.lane.b32.xlu0 %v1263_v44, %s1565_s19  ;;  %vm1891_vm10 = vmpackc.low %vm1882_vm9, %vm1882_vm9 }
  0x6a   : > { %1269 = vrot.lane.b32.xlu0 %v1268_v46, %s1565_s19 }
  0xd8   : > { %v1265_v49 = vpop.permute.xlu0 %1264 }
  0xd9   : > { %v1267_v50 = vunpack.i.h.bf16 %v1265_v49  ;;  %v1266_v51 = vunpack.i.l.bf16 %v1265_v49 }
  0xdb   : > { %v458_v54 = vsel %vm447_vm1, %v1267_v50, 0.0  ;;  %v448_v55 = vsel %vm447_vm1, %v1266_v51, %v1267_v50  ;;  %v456_v62 = vsel %vm447_vm1, 0.0, %v1266_v51 }
  0xdc   : > { %v1270_v56 = vpop.permute.xlu0 %1269  ;;  %v1273_v57 = vpack.i.bf16 %v458_v54, %v448_v55 }
  0xdd   : > { %v1272_v58 = vunpack.i.h.bf16 %v1270_v56  ;;  %v1271_v59 = vunpack.i.l.bf16 %v1270_v56 }
  0xde   : > { %1274 = vrot.lane.b32.xlu1 %v1273_v57, %s1566_s16 }
  0xdf   : > { %v459_v63 = vsel %vm447_vm1, %v1272_v58, 0.0  ;;  %v449_v0 = vsel %vm447_vm1, %v1271_v59, %v1272_v58  ;;  %v457_v1 = vsel %vm447_vm1, 0.0, %v1271_v59 }
  0xe0   : > { %v1283_v2 = vpack.i.bf16 %v457_v1, %v456_v62  ;;  %v1278_v3 = vpack.i.bf16 %v459_v63, %v449_v0  ;;  %v1139_v4 = vpack.c.bf16 %v449_v0, %v448_v55  ;;  %v1142_v6 = vpack.c.bf16 %v457_v1, %v456_v62 }
  0xe2   : > { %1284 = vrot.lane.b32.xlu0 %v1283_v2, %s1566_s16  ;;  %1279 = vrot.lane.b32.xlu1 %v1278_v3, %s1566_s16 }
  0xe3   : > { %1141 = vmatprep.subr.msk.bf16.mxu0 %vm1831_vm4, %v1139_v4 }
  0xe4   : > { %1144 = vmatpush1.bf16.msk.msra.mxu0 %vm1838_vm5, %v1142_v6 }
  0xe6   : > { %1294 = vrot.lane.b32.xlu0 %v1278_v3, %s1567_s13  ;;  %1289 = vrot.lane.b32.xlu1 %v1273_v57, %s1567_s13 }
  0xea   : > { %1304 = vrot.lane.b32.xlu0 %v1273_v57, %s1568_s17  ;;  %1299 = vrot.lane.b32.xlu1 %v1283_v2, %s1567_s13 }
  0xee   : > { %1314 = vrot.lane.b32.xlu0 %v1283_v2, %s1568_s17  ;;  %1309 = vrot.lane.b32.xlu1 %v1278_v3, %s1568_s17 }
  0xf2   : > { %1324 = vrot.lane.b32.xlu0 %v1278_v3, %s1569_s11  ;;  %1319 = vrot.lane.b32.xlu1 %v1273_v57, %s1569_s11 }
  0xf6   : > { %1334 = vrot.lane.b32.xlu0 %v1273_v57, %s1570_s26  ;;  %1329 = vrot.lane.b32.xlu1 %v1283_v2, %s1569_s11 }
  0xfa   : > { %1344 = vrot.lane.b32.xlu0 %v1283_v2, %s1570_s26  ;;  %1339 = vrot.lane.b32.xlu1 %v1278_v3, %s1570_s26 }
  0xfe   : > { %1354 = vrot.lane.b32.xlu0 %v1278_v3, %s1571_s14  ;;  %1349 = vrot.lane.b32.xlu1 %v1273_v57, %s1571_s14 }
 0x102   : > { %1364 = vrot.lane.b32.xlu0 %v1273_v57, %s1572_s15  ;;  %1359 = vrot.lane.b32.xlu1 %v1283_v2, %s1571_s14 }
 0x106   : > { %1374 = vrot.lane.b32.xlu0 %v1283_v2, %s1572_s15  ;;  %1369 = vrot.lane.b32.xlu1 %v1278_v3, %s1572_s15 }
 0x10a   : > { %1384 = vrot.lane.b32.xlu0 %v1278_v3, %s1573_s29  ;;  %1379 = vrot.lane.b32.xlu1 %v1273_v57, %s1573_s29 }
 0x10e   : > { %1389 = vrot.lane.b32.xlu1 %v1283_v2, %s1573_s29  ;;  %668 = vperm.xlu0 %1393, %v665_v13  }
 0x150   : > { %v1275_v15 = vpop.permute.xlu1 %1274 }
 0x151   : > { %v1277_v16 = vunpack.i.h.bf16 %v1275_v15  ;;  %v1276_v17 = vunpack.i.l.bf16 %v1275_v15 }
 0x153   : > { %v615_v24 = vsel %vm2114_vm7, %v1276_v17, %v1277_v16 }
 0x154   : > { %v1285_v18 = vpop.permute.xlu0 %1284  ;;  %v1280_v19 = vpop.permute.xlu1 %1279 }
 0x155   : > { %v1287_v20 = vunpack.i.h.bf16 %v1285_v18  ;;  %v1286_v21 = vunpack.i.l.bf16 %v1285_v18  ;;  %v1282_v22 = vunpack.i.h.bf16 %v1280_v19  ;;  %v1281_v23 = vunpack.i.l.bf16 %v1280_v19 }
 0x157   : > { %v617_v25 = vsel %vm2114_vm7, %v1281_v23, %v1282_v22  ;;  %v614_v26 = vsel %vm2114_vm7, %v1286_v21, %v1276_v17  ;;  %v616_v27 = vsel %vm2114_vm7, %v1287_v20, %v1281_v23  ;;  %vm655_vm7 = vcmask 777216  }
 0x158   : > { %v1295_v28 = vpop.permute.xlu0 %1294  ;;  %v1290_v29 = vpop.permute.xlu1 %1289  ;;  %v1145_v30 = vpack.c.bf16 %v617_v25, %v615_v24  ;;  %v1147_v31 = vpack.c.bf16 %v616_v27, %v614_v26 }
 0x159   : > { %v1297_v33 = vunpack.i.h.bf16 %v1295_v28  ;;  %v1296_v34 = vunpack.i.l.bf16 %v1295_v28  ;;  %v1292_v35 = vunpack.i.h.bf16 %v1290_v29  ;;  %v1291_v36 = vunpack.i.l.bf16 %v1290_v29 }
 0x15a   : > { %1146 = vmatprep.subr.bf16.mxu0 %v1145_v30 }
 0x15b   : > { %v492_v37 = vsel %vm488_vm8, %v1296_v34, %v1297_v33  ;;  %v490_v38 = vsel %vm488_vm8, %v1291_v36, %v1292_v35  ;;  %1148 = vmatpush1.bf16.msra.mxu0 %v1147_v31 }
 0x15c   : > { %v1149_v40 = vpack.c.bf16 %v492_v37, %v490_v38  ;;  %v1305_v41 = vpop.permute.xlu0 %1304  ;;  %v1300_v42 = vpop.permute.xlu1 %1299 }
 0x15d   : > { %v1302_v44 = vunpack.i.h.bf16 %v1300_v42  ;;  %v1301_v45 = vunpack.i.l.bf16 %v1300_v42  ;;  %v1307_v46 = vunpack.i.h.bf16 %v1305_v41  ;;  %v1306_v48 = vunpack.i.l.bf16 %v1305_v41 }
 0x15e   : > { %1151 = vmatprep.subr.msk.bf16.mxu0 %vm1891_vm10, %v1149_v40 }
 0x15f   : > { %v491_v49 = vsel %vm488_vm8, %v1302_v44, %v1296_v34  ;;  %v489_v50 = vsel %vm488_vm8, %v1301_v45, %v1291_v36  ;;  %v515_v58 = vsel %vm513_vm13, %v1306_v48, %v1307_v46 }
 0x160   : > { %v1152_v51 = vpack.c.bf16 %v491_v49, %v489_v50  ;;  %v1315_v52 = vpop.permute.xlu0 %1314  ;;  %v1310_v53 = vpop.permute.xlu1 %1309 }
 0x161   : > { %v1317_v54 = vunpack.i.h.bf16 %v1315_v52  ;;  %v1316_v55 = vunpack.i.l.bf16 %v1315_v52  ;;  %v1312_v56 = vunpack.i.h.bf16 %v1310_v53  ;;  %v1311_v57 = vunpack.i.l.bf16 %v1310_v53 }
 0x162   : > { %1154 = vmatpush1.bf16.msk.msra.mxu0 %vm1908_vm12, %v1152_v51 }
 0x163   : > { %v514_v59 = vsel %vm513_vm13, %v1316_v55, %v1306_v48  ;;  %v516_v62 = vsel %vm513_vm13, %v1317_v54, %v1311_v57  ;;  %v517_v63 = vsel %vm513_vm13, %v1311_v57, %v1312_v56 }
 0x164   : > { %v1155_v0 = vpack.c.bf16 %v517_v63, %v515_v58  ;;  %v1158_v1 = vpack.c.bf16 %v516_v62, %v514_v59  ;;  %v1325_v2 = vpop.permute.xlu0 %1324  ;;  %v1320_v3 = vpop.permute.xlu1 %1319 }
 0x165   : > { %v1327_v4 = vunpack.i.h.bf16 %v1325_v2  ;;  %v1326_v6 = vunpack.i.l.bf16 %v1325_v2  ;;  %v1322_v9 = vunpack.i.h.bf16 %v1320_v3  ;;  %v1321_v12 = vunpack.i.l.bf16 %v1320_v3 }
 0x166   : > { %1157 = vmatprep.subr.msk.bf16.mxu0 %vm1831_vm4, %v1155_v0 }
 0x167   : > { %1160 = vmatpush1.bf16.msk.msra.mxu0 %vm1838_vm5, %v1158_v1  ;;  %v636_v13 = vsel %vm634_vm14, %v1321_v12, %v1322_v9  ;;  %v638_v15 = vsel %vm634_vm14, %v1326_v6, %v1327_v4 }
 0x168   : > { %v1335_v16 = vpop.permute.xlu0 %1334  ;;  %v1330_v17 = vpop.permute.xlu1 %1329  ;;  %v1161_v18 = vpack.c.bf16 %v638_v15, %v636_v13 }
 0x169   : > { %v1332_v19 = vunpack.i.h.bf16 %v1330_v17  ;;  %v1331_v20 = vunpack.i.l.bf16 %v1330_v17  ;;  %v1337_v21 = vunpack.i.h.bf16 %v1335_v16  ;;  %v1336_v22 = vunpack.i.l.bf16 %v1335_v16 }
 0x16a   : > { %1162 = vmatprep.subr.bf16.mxu0 %v1161_v18 }
 0x16b   : > { %v635_v23 = vsel %vm634_vm14, %v1331_v20, %v1321_v12  ;;  %v637_v24 = vsel %vm634_vm14, %v1332_v19, %v1326_v6  ;;  %v540_v33 = vsel %vm538_vm15, %v1336_v22, %v1337_v21 }
 0x16c   : > { %v1345_v25 = vpop.permute.xlu0 %1344  ;;  %v1340_v26 = vpop.permute.xlu1 %1339  ;;  %v1163_v27 = vpack.c.bf16 %v637_v24, %v635_v23 }
 0x16d   : > { %v1347_v28 = vunpack.i.h.bf16 %v1345_v25  ;;  %v1346_v29 = vunpack.i.l.bf16 %v1345_v25  ;;  %v1342_v30 = vunpack.i.h.bf16 %v1340_v26  ;;  %v1341_v31 = vunpack.i.l.bf16 %v1340_v26 }
 0x16e   : > { %1164 = vmatpush1.bf16.msra.mxu0 %v1163_v27 }
 0x16f   : > { %v539_v34 = vsel %vm538_vm15, %v1346_v29, %v1336_v22  ;;  %v541_v35 = vsel %vm538_vm15, %v1347_v28, %v1341_v31  ;;  %v542_v36 = vsel %vm538_vm15, %v1341_v31, %v1342_v30 }
 0x170   : > { %v1165_v37 = vpack.c.bf16 %v542_v36, %v540_v33  ;;  %v1168_v38 = vpack.c.bf16 %v541_v35, %v539_v34  ;;  %v1355_v40 = vpop.permute.xlu0 %1354  ;;  %v1350_v41 = vpop.permute.xlu1 %1349 }
 0x171   : > { %v1357_v42 = vunpack.i.h.bf16 %v1355_v40  ;;  %v1356_v44 = vunpack.i.l.bf16 %v1355_v40  ;;  %v1352_v45 = vunpack.i.h.bf16 %v1350_v41  ;;  %v1351_v46 = vunpack.i.l.bf16 %v1350_v41 }
 0x172   : > { %1167 = vmatprep.subr.msk.bf16.mxu0 %vm1891_vm10, %v1165_v37 }
 0x173   : > { %v567_v48 = vsel %vm563_vm6, %v1356_v44, %v1357_v42  ;;  %v565_v49 = vsel %vm563_vm6, %v1351_v46, %v1352_v45  ;;  %1170 = vmatpush1.bf16.msk.msra.mxu0 %vm1908_vm12, %v1168_v38  ;;  %v877_v45 = vld [vmem:[%s2109_s5] sm:$0xff] }
 0x174   : > { %v1171_v50 = vpack.c.bf16 %v567_v48, %v565_v49  ;;  %v1365_v51 = vpop.permute.xlu0 %1364  ;;  %v1360_v52 = vpop.permute.xlu1 %1359 }
 0x175   : > { %v1362_v53 = vunpack.i.h.bf16 %v1360_v52  ;;  %v1361_v54 = vunpack.i.l.bf16 %v1360_v52  ;;  %v1367_v55 = vunpack.i.h.bf16 %v1365_v51  ;;  %v1366_v56 = vunpack.i.l.bf16 %v1365_v51 }
 0x176   : > { %1173 = vmatprep.subr.msk.bf16.mxu0 %vm1831_vm4, %v1171_v50  ;;  %vm588_vm4 = vcmask 769024  }
 0x177   : > { %v566_v57 = vsel %vm563_vm6, %v1362_v53, %v1356_v44  ;;  %v564_v58 = vsel %vm563_vm6, %v1361_v54, %v1351_v46  ;;  %v657_v5 = vsel %vm655_vm7, %v1366_v56, %v1367_v55  ;;  %v1575_v44 = vmov 0.0  }
 0x178   : > { %v1174_v59 = vpack.c.bf16 %v566_v57, %v564_v58  ;;  %v1375_v62 = vpop.permute.xlu0 %1374  ;;  %v1370_v63 = vpop.permute.xlu1 %1369  ;;  %957 = vmatprep.mubr.f32.mxu1 %v1575_v44 }
 0x179   : > { %v1377_v0 = vunpack.i.h.bf16 %v1375_v62  ;;  %v1376_v1 = vunpack.i.l.bf16 %v1375_v62  ;;  %v1372_v2 = vunpack.i.h.bf16 %v1370_v63  ;;  %v1371_v3 = vunpack.i.l.bf16 %v1370_v63 }
 0x17a   : > { %1176 = vmatpush1.bf16.msk.msra.mxu0 %vm1838_vm5, %v1174_v59 }
 0x17b   : > { %v659_v4 = vsel %vm655_vm7, %v1371_v3, %v1372_v2  ;;  %v656_v6 = vsel %vm655_vm7, %v1376_v1, %v1366_v56  ;;  %v658_v9 = vsel %vm655_vm7, %v1377_v0, %v1371_v3 }
 0x17c   : > { %v1385_v12 = vpop.permute.xlu0 %1384  ;;  %v1380_v13 = vpop.permute.xlu1 %1379  ;;  %v1177_v15 = vpack.c.bf16 %v659_v4, %v657_v5  ;;  %v1179_v16 = vpack.c.bf16 %v658_v9, %v656_v6 }
 0x17d   : > { %v1387_v17 = vunpack.i.h.bf16 %v1385_v12  ;;  %v1386_v18 = vunpack.i.l.bf16 %v1385_v12  ;;  %v1382_v19 = vunpack.i.h.bf16 %v1380_v13  ;;  %v1381_v20 = vunpack.i.l.bf16 %v1380_v13 }
 0x17e   : > { %1178 = vmatprep.subr.bf16.mxu0 %v1177_v15 }
 0x17f   : > { %v592_v7 = vsel %vm588_vm4, %v1386_v18, %v1387_v17  ;;  %v590_v21 = vsel %vm588_vm4, %v1381_v20, %v1382_v19  ;;  %1180 = vmatpush1.bf16.msra.mxu0 %v1179_v16 }
 0x180   : > { %v1181_v22 = vpack.c.bf16 %v592_v7, %v590_v21  ;;  %v1390_v23 = vpop.permute.xlu1 %1389 }
 0x181   : > { %v1392_v24 = vunpack.i.h.bf16 %v1390_v23  ;;  %v1391_v25 = vunpack.i.l.bf16 %v1390_v23 }
 0x182   : > { %1183 = vmatprep.subr.msk.bf16.mxu0 %vm1891_vm10, %v1181_v22 }
 0x183   : > { %v591_v26 = vsel %vm588_vm4, %v1392_v24, %v1386_v18  ;;  %v589_v27 = vsel %vm588_vm4, %v1391_v25, %v1381_v20 }
 0x184   : > { %v1184_v28 = vpack.c.bf16 %v591_v26, %v589_v27 }
 0x186   : > { %1186 = vmatpush1.bf16.msk.msra.mxu0 %vm1908_vm12, %v1184_v28 }
 0x189   : > { %741 = vmatmul.mubr.f32.vlgmr.msra.gmra.mrb[0].mxu0 %v1866_v8 }
 0x18d   : > { %v669_v29 = vpop.permute.xlu0 %668 }
 0x25c   : > { %v742_v30 = vpop.f32.mrb[0].mxu0 }
 0x25d   : > { %v743_v31 = vadd.f32 %v742_v30, %v669_v29  ;;  %v744_v33 = vpop.f32.mrb[1].mxu0 }
 0x25e   : > { %v745_v34 = vadd.f32 %v744_v33, %v669_v29 }
 0x25f   : > { %749 = vrot.lane.b32.xlu1 %v743_v31, %s1565_s19 }
 0x263   : > { %751 = vrot.lane.b32.xlu1 %v745_v34, %s1565_s19 }
 0x2d1   : > { %v750_v39 = vpop.permute.xlu1 %749 }
 0x2d2   : > { %v1958_v35 = vsel %vm447_vm1, 0.0, %v750_v39 }
 0x2d3   : > { %775 = vrot.lane.b32.xlu1 %v1958_v35, %s1568_s17  ;;  %v823_v42 = vrot.slane %v1958_v35, 4  ;;  %v759_v22 = vsel %vm1820_vm3, %v1958_v35, 0.0 }
 0x2d5   : > { %v752_v47 = vpop.permute.xlu1 %751 }
 0x2d6   : > { %v1963_v36 = vsel %vm447_vm1, %v750_v39, %v752_v47  ;;  %v758_v8 = vsel %vm447_vm1, %v752_v47, 0.0  ;;  %vm2146_vm1 = vcmask 1039360  }
 0x2d7   : > { %763 = vrot.lane.b32.xlu1 %v1958_v35, %s1567_s13  ;;  %v1394_v37 = vpack.i.bf16 %v758_v8, %v1963_v36  ;;  %v824_v38 = vrot.slane %v1963_v36, 4  ;;  %v825_v40 = vrot.slane %v758_v8, 4  ;;  %vm2147_vm5 = vmmov %vm2146_vm1 }
 0x2d9   : > { %1395 = vrot.lane.b32.xlu0 %v1394_v37, %s1568_s17  ;;  %v1424_v41 = vpack.i.bf16 %v825_v40, %v824_v38  ;;  %s295_s17 = scalar_lea.vmem [#allocation7], %s1098_s30 }
 0x2db   : > { %787 = vrot.lane.b32.xlu1 %v1958_v35, %s1570_s26 }
 0x2dd   : > { %1400 = vrot.lane.b32.xlu0 %v1394_v37, %s1567_s13  ;;  %s1138_s13 = sshll.u32 %s1633_s25, 7  ;;  %s1576_s25 = smov [#allocation7]  }
 0x2de   : > { %s1495_s30 = sshll.u32 %s1576_s25, 4  ;;  %s1496_s30 = int_to_ptr.vmem [resolvable:$false] %s1495_s30 }
 0x2df   : > { %799 = vrot.lane.b32.xlu1 %v1958_v35, %s1571_s14  ;;  %s1497_s12 = scalar_lea.vmem %s1496_s30, 256 }
 0x2e1   : > { %1410 = vrot.lane.b32.xlu0 %v1394_v37, %s1571_s14 }
 0x2e3   : > { %1405 = vrot.lane.b32.xlu1 %v1394_v37, %s1570_s26 }
 0x2e5   : > { %1415 = vrot.lane.b32.xlu0 %v1394_v37, %s1569_s11 }
 0x2e7   : > { %1425 = vrot.lane.b32.xlu1 %v1424_v41, %s1572_s15 }
 0x2e9   : > { %826 = vrot.lane.b32.xlu0 %v823_v42, %s1566_s16 }
 0x2eb   : > { %858 = vrot.lane.b32.xlu1 %v823_v42, %s1572_s15  ;;  %s2060_s15 = scalar_lea.hbm %s2110_s6, %s1138_s13 }
 0x2ed   : > { %1420 = vrot.lane.b32.xlu0 %v1424_v41, %s1566_s16 }
 0x2ef   : > { %815 = vrot.lane.b32.xlu1 %v758_v8, %s1573_s29 }
 0x2f1   : > { %842 = vrot.lane.b32.xlu0 %v1958_v35, %s1569_s11  ;;  %s998_s11 = sshll.u32 %s295_s17, 4  ;;  %s2062_s11 = int_to_ptr.vmem [resolvable:$true] %s998_s11 }
 0x2f2   : > { %s1491_s7 = scalar_lea.vmem %s2062_s11, 128  ;;  %p1498_p0 = scmp.lt.s32.totalorder %s2062_s11, %s1496_s30 }
 0x2f3   : > { %880 = vperm.xlu1 %1429, %v877_v45   ;;  %p1492_p9 = scmp.ne.s32.totalorder %s2062_s11, %s1491_s7  ;;  %p1499_p5 = scmp.lt.s32.totalorder %s1497_s12, %s1491_s7 }
 0x2f5   : > { %813 = vrot.lane.b32.xlu0 %v1963_v36, %s1573_s29  ;;  %p1493_p12 = pnand %p1492_p9, %p1704_p8  ;;  %p1500_p10 = por %p1499_p5, %p1498_p0 }
 0x2f7   : > { %p1494_p13 = pneg %p1493_p12 }
 0x2f9   : > { %811 = vrot.lane.b32.xlu0 %v1958_v35, %s1573_s29  ;;  %v760_v35 = vsel %vm1813_vm2, %v1963_v36, 0.0  ;;  %s984_s29 = scalar_lea.sflag [#allocation4], %s1753_s20  ;;  %p1501_p1 = pnand %p1500_p10, %p1494_p13 }
 0x345   : > { %v776_v46 = vpop.permute.xlu1 %775 }
 0x349   : > { %v764_v48 = vpop.permute.xlu1 %763 }
 0x34b   : > { %v1396_v49 = vpop.permute.xlu0 %1395 }
 0x34c   : > { %v1398_v53 = vunpack.i.h.bf16 %v1396_v49  ;;  %v1397_v54 = vunpack.i.l.bf16 %v1396_v49 }
 0x34d   : > { %v788_v50 = vpop.permute.xlu1 %787 }
 0x34e   : > { %v781_v63 = vsel %vm513_vm13, %v776_v46, %v1397_v54  ;;  %v782_v0 = vsel %vm513_vm13, %v1397_v54, %v1398_v53 }
 0x34f   : > { %v1401_v51 = vpop.permute.xlu0 %1400  ;;  %v786_v4 = vsel %vm1813_vm2, %v782_v0, 0.0  ;;  %v785_v6 = vsel %vm1820_vm3, %v781_v63, 0.0 }
 0x350   : > { %v1403_v57 = vunpack.i.h.bf16 %v1401_v51  ;;  %v1402_v58 = vunpack.i.l.bf16 %v1401_v51  ;;  %v839_v27 = vrot.slane %v786_v4, 4  ;;  %v838_v28 = vrot.slane %v785_v6, 4 }
 0x351   : > { %v800_v52 = vpop.permute.xlu1 %799 }
 0x352   : > { %v770_v5 = vsel %vm488_vm8, %v1402_v58, %v1403_v57  ;;  %v769_v16 = vsel %vm488_vm8, %v764_v48, %v1402_v58 }
 0x353   : > { %v1411_v55 = vpop.permute.xlu0 %1410  ;;  %v774_v21 = vsel %vm1882_vm9, %v770_v5, 0.0  ;;  %v773_v23 = vsel %vm1897_vm11, %v769_v16, 0.0 }
 0x354   : > { %v1413_v9 = vunpack.i.h.bf16 %v1411_v55  ;;  %v1412_v12 = vunpack.i.l.bf16 %v1411_v55  ;;  %v871_v47 = vsel %vm430_vm0, %v774_v21, %v839_v27  ;;  %v870_v8 = vsel %vm430_vm0, %v773_v23, %v838_v28 }
 0x355   : > { %v1406_v56 = vpop.permute.xlu1 %1405 }
 0x356   : > { %v1408_v59 = vunpack.i.h.bf16 %v1406_v56  ;;  %v1407_v62 = vunpack.i.l.bf16 %v1406_v56  ;;  %v806_v24 = vsel %vm563_vm6, %v1412_v12, %v1413_v9  ;;  %v805_v37 = vsel %vm563_vm6, %v800_v52, %v1412_v12 }
 0x357   : > { %v1416_v1 = vpop.permute.xlu0 %1415  ;;  %v810_v41 = vsel %vm1813_vm2, %v806_v24, 0.0  ;;  %v809_v54 = vsel %vm1820_vm3, %v805_v37, 0.0  ;;  %vm883_vm2 = vcmask 293888  }
 0x358   : > { %v794_v2 = vsel %vm538_vm15, %v1407_v62, %v1408_v59  ;;  %v1418_v13 = vunpack.i.h.bf16 %v1416_v1  ;;  %v1417_v18 = vunpack.i.l.bf16 %v1416_v1  ;;  %v793_v7 = vsel %vm538_vm15, %v788_v50, %v1407_v62  ;;  %v876_v1 = vld [vmem:[%s2108_s4] sm:$0xff] }
 0x359   : > { %v1426_v3 = vpop.permute.xlu1 %1425  ;;  %v798_v17 = vsel %vm1882_vm9, %v794_v2, 0.0  ;;  %v797_v34 = vsel %vm1897_vm11, %v793_v7, 0.0 }
 0x35a   : > { %v1428_v19 = vunpack.i.h.bf16 %v1426_v3  ;;  %v1427_v20 = vunpack.i.l.bf16 %v1426_v3  ;;  %v855_v25 = vrot.slane %v798_v17, 4  ;;  %v849_v29 = vsel %vm634_vm14, %v1417_v18, %v1418_v13 }
 0x35b   : > { %v827_v15 = vpop.permute.xlu0 %826  ;;  %v854_v48 = vrot.slane %v797_v34, 4  ;;  %v964_v3 = vcombine.high %v1772_v10, %v1772_v10 }
 0x35c   : > { %v865_v30 = vsel %vm655_vm7, %v1427_v20, %v1428_v19  ;;  %v873_v36 = vsel %vm430_vm0, %v849_v29, %v855_v25 }
 0x35d   : > { %v859_v39 = vpop.permute.xlu1 %858  ;;  %v875_v46 = vsel %vm430_vm0, %v810_v41, %v865_v30 }
 0x35e   : > { %v864_v52 = vsel %vm655_vm7, %v859_v39, %v1427_v20  ;;  %v1191_v60 = vpack.c.bf16 %v875_v46, %v873_v36 }
 0x35f   : > { %v1421_v26 = vpop.permute.xlu0 %1420  ;;  %v874_v57 = vsel %vm430_vm0, %v809_v54, %v864_v52 }
 0x360   : > { %v1423_v31 = vunpack.i.h.bf16 %v1421_v26  ;;  %v1422_v33 = vunpack.i.l.bf16 %v1421_v26 }
 0x361   : > { %v816_v55 = vpop.permute.xlu1 %815 }
 0x362   : > { %v833_v38 = vsel %vm2146_vm1, %v1422_v33, %v1423_v31  ;;  %v832_v40 = vsel %vm2147_vm5, %v827_v15, %v1422_v33 }
 0x363   : > { %v843_v42 = vpop.permute.xlu0 %842  ;;  %v869_v44 = vsel %vm430_vm0, %v760_v35, %v833_v38  ;;  %v868_v45 = vsel %vm430_vm0, %v759_v22, %v832_v40 }
 0x364   : > { %v848_v49 = vsel %vm634_vm14, %v843_v42, %v1417_v18  ;;  %v1187_v50 = vpack.c.bf16 %v871_v47, %v869_v44  ;;  %v1189_v51 = vpack.c.bf16 %v870_v8, %v868_v45 }
 0x365   : > { %v872_v53 = vsel %vm430_vm0, %v848_v49, %v854_v48 }
 0x366   : > { %1188 = vmatprep.subr.bf16.mxu1 %v1187_v50  ;;  %v1193_v59 = vpack.c.bf16 %v874_v57, %v872_v53 }
 0x367   : > { %v814_v56 = vpop.permute.xlu0 %813  ;;  %1190 = vmatpush1.bf16.msra.mxu1 %v1189_v51 }
 0x368   : > { %v818_v58 = vsel %vm588_vm4, %v814_v56, %v816_v55  ;;  %1192 = vmatprep.subr.bf16.mxu1 %v1191_v60 }
 0x369   : > { %v822_v62 = vsel %vm1882_vm9, %v818_v58, 0.0 }
 0x36b   : > { %v812_v63 = vpop.permute.xlu0 %811  ;;  %1194 = vmatpush1.bf16.msra.mxu1 %v1193_v59 }
 0x36c   : > { %v817_v0 = vsel %vm588_vm4, %v812_v63, %v814_v56  ;;  %1128 = vmatprep.subr.msk.mxu1 %vm430_vm0, %v822_v62 }
 0x36d   : > { %v821_v61 = vsel %vm1897_vm11, %v817_v0, 0.0 }
 0x36f   : > { %1129 = vmatpush1.msk.msra.mxu1 %vm430_vm0, %v821_v61 }
 0x370   : > { %1130 = vmatmul.mubr.msk.f32.vlgmr.msra.gmra.mrb[0].mxu1 %vm883_vm2, %v876_v1 }
 0x372   : > { %v881_v32 = vpop.permute.xlu1 %880 }
 0x443   : > { %v959_v2 = vpop.f32.mrb[0].mxu1 }
 0x444   : > { %v960_v5 = vadd.f32 %v959_v2, %v881_v32  ;;  %v961_v4 = vpop.f32.mrb[1].mxu1 }
 0x445   : > { %v962_v6 = vadd.f32 %v961_v4, %v881_v32 }
 0x446   : > { %v966_v43 = vmul.f32 %v960_v5, %v1772_v10  ;;  %v970_v9 = vrot.slane %v960_v5, 4 }
 0x447   : > { %v967_v12 = vmul.f32 %v964_v3, %v962_v6  ;;  %v971_v13 = vrot.slane %v962_v6, 4 }
 0x448   : > { %v974_v15 = vadd.f32 %v970_v9, %v966_v43 }
 0x449   : > { %v975_v16 = vadd.f32 %v971_v13, %v967_v12 }
 0x44a   : > { %v976_v17 = vadd.f32 %v974_v15, %v1774_v11 }
 0x44b   : > { %v977_v18 = vadd.f32 %v975_v16, %v1780_v14 }
 0x44d   : > { %v980_v19 = vcombine.low %v976_v17, %v977_v18 }
 0x44f   : > { %982 = vst [vmem:[%s295_s17] sm:$0xff] %v980_v19 }
 0x450   : > { %1504 = shalt.err (!%p1501_p1)
}
 0x451   : > { %s1505_s20 = scalar_lea.hbm %s2060_s15, 128  ;;  %s1509_s19 = scalar_lea.hbm %s2110_s6, 256 }
 0x452   : > { %p1506_p2 = scmp.ne.s32.totalorder %s2060_s15, %s1505_s20  ;;  %p1510_p11 = scmp.lt.u32.totalorder %s2060_s15, %s2110_s6 }
 0x453   : > { %p1511_p4 = scmp.lt.u32.totalorder %s1509_s19, %s1505_s20  ;;  %p1513_p9 = scmp.lt.u32.totalorder %s1505_s20, %s2060_s15 }
 0x454   : > { %p1507_p7 = pnand %p1506_p2, %p1704_p8 }
 0x455   : > { %p1512_p6 = por %p1511_p4, %p1510_p11 }
 0x456   : > { %p1508_p3 = pneg %p1507_p7 }
 0x457   : > { %p1514_p12 = por %p1513_p9, %p1512_p6 }
 0x459   : > { %p1515_p13 = pnand %p1514_p12, %p1508_p3 }
 0x45b   : > { %1518 = shalt.err (!%p1515_p13)
}
 0x45c   : > { %1201 = dma.vmem_to_hbm [thread:$0]  (%p1704_p8), %s2062_s11, 128, %s2060_s15, %s984_s29  }
 0x45d PF: > { %s1010_s17 = sand.u32 1, %s1549_s21   ;;  %p2148_p0 = scmp.ne.s32.totalorder %s2116_s28, 0 }
 0x45e   : > { %p2149_p5 = scmp.ge.s32.totalorder %s1561_s24, 2  ;;  %s1011_s26 = scalar_lea.sflag [#allocation4], %s1010_s17 }
 0x460   : > { %p1212_p10 = pnand %p2149_p5, %p2148_p0 }
 0x462   : > { %1544 = dma.done.wait (!%p1212_p10), %s1011_s26, 128  }
 0x463   : > { %1546 = vsyncadd (!%p1212_p10), %s1011_s26, 4294967168  ;;  %p20_p1 = scmp.ge.s32.totalorder %s1660_s8, 4   ;;  %s2150_s21 = smov %s1553_s22 }
 0x464   : > { %s2151_s22 = smov %s1557_s23  ;;  %s2152_s23 = smov %s1696_s10 }
 0x465   : > { %s2153_s24 = smov %s1660_s8  ;;  %22 = sbr.rel (!%p20_p1) target bundleno = 6 (0x6), region = 96 }
 0x46c   :  { %1016 = vsyncpa [#allocation3], 1 }
 0x46d   :  { %1018 = vsyncpa [#allocation3 + $0x1], 1 }
 0x46e   :  { %1019 = vsyncpa [#allocation6], 1 }
 0x46f   :  { %1020 = vsyncpa [#allocation4], 1 }
 0x470   :  { %1022 = vsyncpa [#allocation4 + $0x1], 1 }

</bundles_post_ra>
